<compile_context>
chip_gen: v7x
topology: tpu7x:2x2x1
jax: 0.10.0
libtpu: 0.0.40
codegen_flags: <defaults>
</compile_context>

<pallas_src>
import functools

import jax
import jax.numpy as jnp
import numpy as np
from jax.experimental import pallas as pl
from jax.experimental.pallas import tpu as pltpu


# ----------------------------- helpers -------------------------------------


def _round_up(v, m):
    return ((v + m - 1) // m) * m


def _sublane_pad(dtype):
    # second-minor dim pads to 8 (f32), 16 (bf16/f16), 32 (int8/fp8)
    return {4: 8, 2: 16, 1: 32}.get(jnp.dtype(dtype).itemsize, 8)


def _vmem_budget_bytes():
    """Generation-aware VMEM budget (v7x: ~48 MiB of 64; v5e/v6e: ~96 MiB)."""
    try:
        cap = int(pltpu.get_tpu_info().vmem_capacity_bytes)
    except Exception:
        cap = 64 << 20          # conservative minimum (v7x per-TC)
    return min((cap * 3) // 4, 96 << 20)


def _choose_tile_hw(hw, c, dtype, tile_budget_bytes):
    """Pick the lane-tile for the (C, HW) blocks of x/y.

    Returns (tile_hw, n_t, needs_mask).  Accounts for sublane padding of C and
    double-buffering of both inputs (x and y).
    """
    itemsize = jnp.dtype(dtype).itemsize
    cp = _round_up(c, _sublane_pad(dtype))
    per_lane_bytes = 4 * cp * itemsize          # 2 inputs * 2 pipeline buffers
    cap = max(128, tile_budget_bytes // per_lane_bytes)
    if hw <= cap:
        return hw, 1, False                     # full extent: always legal
    cap = (cap // 128) * 128
    if hw % 128 == 0:
        for t in range(cap, 127, -128):
            if hw % t == 0:
                return t, hw // t, False
        return 128, hw // 128, False
    # Non-divisible HW: fixed 128-multiple tile + masked tail tile.
    return cap, pl.cdiv(hw, cap), True


def _choose_row_tile(r, hw_g, dtype, tile_budget_bytes):
    """Row-tile for the (R, Hg*Wg) gen blocks of the TV kernel."""
    itemsize = jnp.dtype(dtype).itemsize
    bytes_per_row = _round_up(hw_g, 128) * itemsize
    cap = max(1, tile_budget_bytes // (2 * bytes_per_row))   # double-buffered
    if r <= cap:
        return r
    if r % 8 == 0:
        start = max(8, (min(cap, r) // 8) * 8)
        for cand in range(start, 7, -8):
            if r % cand == 0:
                return cand
    return r      # pathological shapes fall back to full extent


# ----------------------------- kernels --------------------------------------


def _mse_cos_kernel(lam_ref, x_ref, y_ref, out_ref, acc_ref, *,
                    inv_mse_n, inv_cos_n, eps, hw, tile_hw, needs_mask):
    # lam_ref : SMEM (1,) f32        -> [cos_lambda]
    # x_ref   : VMEM (C, tile_hw)    input tile (native dtype, upcast here)
    # y_ref   : VMEM (C, tile_hw)
    # out_ref : VMEM (1, 1) f32      per-batch loss partial (written at last t)
    # acc_ref : VMEM (1, 1) f32      scratch accumulator
    t = pl.program_id(1)

    @pl.when(t == 0)
    def _init():
        acc_ref[...] = jnp.zeros_like(acc_ref)

    x = x_ref[...].astype(jnp.float32)
    y = y_ref[...].astype(jnp.float32)

    if needs_mask:
        col = jax.lax.broadcasted_iota(jnp.int32, x.shape, 1) + t * tile_hw
        valid = col < hw
        x = jnp.where(valid, x, 0.0)
        y = jnp.where(valid, y, 0.0)

    # Channel reductions (shared by MSE and cosine terms).
    dot = jnp.sum(x * y, axis=0, keepdims=True)      # (1, T)
    nx2 = jnp.sum(x * x, axis=0, keepdims=True)
    ny2 = jnp.sum(y * y, axis=0, keepdims=True)

    # ---- MSE partial via  sum((x-y)^2) = sum(x^2) + sum(y^2) - 2*sum(xy) ----
    sq_sum = jnp.sum(nx2) + jnp.sum(ny2) - 2.0 * jnp.sum(dot)

    # ---- Cosine partial: clamp the NORM PRODUCT at eps (normal f32) --------
    nrm = jnp.sqrt(nx2) * jnp.sqrt(ny2)
    sim = dot / jnp.maximum(nrm, eps)
    one_minus = 1.0 - sim
    if needs_mask:
        lane = jax.lax.broadcasted_iota(jnp.int32, sim.shape, 1) + t * tile_hw
        one_minus = jnp.where(lane < hw, one_minus, 0.0)
    cos_sum = jnp.sum(one_minus)

    acc_ref[...] = acc_ref[...] + (sq_sum * inv_mse_n
                                   + lam_ref[0] * cos_sum * inv_cos_n)

    @pl.when(t == pl.num_programs(1) - 1)
    def _write():
        out_ref[...] = acc_ref[...]


def _tv_kernel(g_ref, out_ref, *, gen_h, gen_w):
    # g_ref   : VMEM (row_tile, Hg*Wg)  lane-dense stripe of gen
    # out_ref : VMEM (1, 1) f32         per-stripe TV partial (unweighted)
    g = g_ref[...].astype(jnp.float32)
    tv = jnp.float32(0.0)
    if gen_w > 1:
        # W-direction neighbors in flattened HW; mask pairs crossing a row.
        dw = g[:, :-1] - g[:, 1:]
        col = jax.lax.broadcasted_iota(jnp.int32, dw.shape, 1)
        valid = (col % gen_w) != (gen_w - 1)
        tv = tv + jnp.sum(jnp.where(valid, dw * dw, 0.0))
    if gen_h > 1:
        # H-direction neighbors: offset Wg in flattened HW; rows are whole
        # (n, c) planes, so no mask is needed.
        dh = g[:, :(gen_h - 1) * gen_w] - g[:, gen_w:]
        tv = tv + jnp.sum(dh * dh)
    out_ref[...] = jnp.reshape(tv, (1, 1))


# ----------------------------- wrapper ---------------------------------------


def optimizer_losses(x, y, gen, *, cos_lambda=1.0, tv_lambda=1.0, eps=1e-20):
    """x, y: (N, C, H, W); gen: (Ng, Cg, Hg, Wg). Returns scalar f32 loss."""
    N, C, H, W = x.shape
    Ng, Cg, Hg, Wg = gen.shape
    HW = H * W

    # Free, contiguous reshapes — no HBM transpose pass.
    x3 = x.reshape(N, C, HW)
    y3 = y.reshape(N, C, HW)

    vmem_limit = int(_vmem_budget_bytes())
    tile_budget = int(vmem_limit * 0.85)     # headroom for out/scratch/internal

    # -------------------- main kernel: MSE + cosine --------------------------
    tile_hw, n_t, needs_mask = _choose_tile_hw(HW, C, x3.dtype, tile_budget)

    lam = jnp.array([cos_lambda], dtype=jnp.float32)

    kernel = functools.partial(
        _mse_cos_kernel,
        inv_mse_n=float(1.0 / (N * C * HW)),
        inv_cos_n=float(1.0 / (N * HW)),
        eps=float(eps),
        hw=HW,
        tile_hw=tile_hw,
        needs_mask=needs_mask,
    )

    flops = 6 * N * C * HW + 8 * N * HW
    bytes_accessed = (x3.size * x3.dtype.itemsize
                      + y3.size * y3.dtype.itemsize + 4 * N + 4)

    partial = pl.pallas_call(
        kernel,
        out_shape=jax.ShapeDtypeStruct((N, 1, 1), jnp.float32),
        grid_spec=pltpu.PrefetchScalarGridSpec(
            num_scalar_prefetch=1,
            grid=(N, n_t),
            in_specs=[
                pl.BlockSpec((None, C, tile_hw), lambda n, t, lam: (n, 0, t)),
                pl.BlockSpec((None, C, tile_hw), lambda n, t, lam: (n, 0, t)),
            ],
            out_specs=pl.BlockSpec((None, 1, 1), lambda n, t, lam: (n, 0, 0)),
            scratch_shapes=[pltpu.VMEM((1, 1), jnp.float32)],
        ),
        compiler_params=pltpu.CompilerParams(
            dimension_semantics=("parallel", "arbitrary"),
            vmem_limit_bytes=vmem_limit),
        cost_estimate=pl.CostEstimate(
            flops=flops, transcendentals=3 * N * HW,
            bytes_accessed=bytes_accessed),
    )(lam, x3, y3)

    # -------------------- TV kernel (separate, tiled) -------------------------
    R = Ng * Cg
    HWg = Hg * Wg
    g2 = gen.reshape(R, HWg)
    row_tile = _choose_row_tile(R, HWg, g2.dtype, tile_budget)
    n_r = max(1, R // row_tile) if R % row_tile == 0 else 1
    if n_r == 1:
        row_tile = R

    tv_partials = pl.pallas_call(
        functools.partial(_tv_kernel, gen_h=Hg, gen_w=Wg),
        out_shape=jax.ShapeDtypeStruct((n_r, 1, 1), jnp.float32),
        grid_spec=pl.GridSpec(
            grid=(n_r,),
            in_specs=[pl.BlockSpec((row_tile, HWg), lambda r: (r, 0))],
            out_specs=pl.BlockSpec((None, 1, 1), lambda r: (r, 0, 0)),
        ),
        compiler_params=pltpu.CompilerParams(
            dimension_semantics=("parallel",),
            vmem_limit_bytes=vmem_limit),
        cost_estimate=pl.CostEstimate(
            flops=8 * R * HWg, transcendentals=0,
            bytes_accessed=g2.size * g2.dtype.itemsize + 4 * n_r),
    )(g2)

    # Tiny glue: sum per-batch / per-stripe partials and apply tv_lambda.
    return jnp.sum(partial) + jnp.float32(tv_lambda) * jnp.sum(tv_partials)


# ----------------------------- reference & test ------------------------------


def _reference(x, y, gen, cos_lambda=1.0, tv_lambda=1.0, eps=1e-20):
    x = x.astype(jnp.float32)
    y = y.astype(jnp.float32)
    gen = gen.astype(jnp.float32)
    mse = jnp.mean((x - y) ** 2)
    dot = jnp.sum(x * y, axis=1)
    nx = jnp.sqrt(jnp.sum(x * x, axis=1))
    ny = jnp.sqrt(jnp.sum(y * y, axis=1))
    sim = dot / jnp.maximum(nx * ny, eps)
    cos_term = jnp.mean(1.0 - sim)
    w_var = jnp.sum((gen[:, :, :, :-1] - gen[:, :, :, 1:]) ** 2)
    h_var = jnp.sum((gen[:, :, :-1, :] - gen[:, :, 1:, :]) ** 2)
    tv = h_var + w_var
    return mse + cos_lambda * cos_term + tv_lambda * tv


if __name__ == "__main__":
    key = jax.random.PRNGKey(0)
    kx, ky, kg = jax.random.split(key, 3)

    N, C, H, W = 2, 4, 16, 16     # x, y feature maps
    Cg = 3                        # gen is an image batch (N, 3, H, W)

    x = jax.random.normal(kx, (N, C, H, W), dtype=jnp.float32)
    y = jax.random.normal(ky, (N, C, H, W), dtype=jnp.float32)
    gen = jax.random.normal(kg, (N, Cg, H, W), dtype=jnp.float32)

    loss = optimizer_losses(x, y, gen, cos_lambda=1.0, tv_lambda=1.0)
    loss = jax.block_until_ready(loss)

    ref = jax.block_until_ready(_reference(x, y, gen))
    np.testing.assert_allclose(np.asarray(loss), np.asarray(ref),
                               rtol=1e-4, atol=1e-4)
    print("KERNEL_OK")
</pallas_src>

<mosaic_0001>
module attributes {stable_mosaic.version = 11 : i64} {
  func.func @_mse_cos_kernel(%arg0: i32, %arg1: i32, %arg2: memref<1xf32, #tpu.memory_space<smem>>, %arg3: memref<1x4x256xf32, #tpu.memory_space<vmem>>, %arg4: memref<1x4x256xf32, #tpu.memory_space<vmem>>, %arg5: memref<1x1x1xf32, #tpu.memory_space<vmem>>, %arg6: memref<1x1xf32, #tpu.memory_space<vmem>>) attributes {dimension_semantics = [#tpu.dimension_semantics<parallel>, #tpu.dimension_semantics<arbitrary>], iteration_bounds = array<i64: 2, 1>, scalar_prefetch = 1 : i64, scratch_operands = 1 : i64, tpu.core_type = #tpu.core_type<tc>, window_params = [{transform_indices = @transform_0, window_bounds = array<i64: 1, 4, 256>}, {transform_indices = @transform_1, window_bounds = array<i64: 1, 4, 256>}, {transform_indices = @transform_2, window_bounds = array<i64: 1, 1, 1>}]} {
    %c0_i32 = arith.constant 0 : i32
    %0 = arith.cmpi eq, %arg1, %c0_i32 : i32
    %1 = arith.extui %0 : i1 to i32
    %c0_i32_0 = arith.constant 0 : i32
    %2 = arith.cmpi ne, %1, %c0_i32_0 : i32
    scf.if %2 {
      %cst_24 = arith.constant 0.000000e+00 : f32
      %55 = vector.broadcast %cst_24 : f32 to vector<1x1xf32>
      %c0_25 = arith.constant 0 : index
      %c0_26 = arith.constant 0 : index
      %56 = vector.load %arg6[%c0_25, %c0_26] : memref<1x1xf32, #tpu.memory_space<vmem>>, vector<1x1xf32>
      tpu.vector_store %arg6[%c0_25, %c0_26], %55 {strides = array<i32>} : memref<1x1xf32, #tpu.memory_space<vmem>>, vector<1x1xf32>,
    } else {
    }
    %c0 = arith.constant 0 : index
    %c0_1 = arith.constant 0 : index
    %c0_2 = arith.constant 0 : index
    %3 = vector.load %arg3[%c0, %c0_1, %c0_2] : memref<1x4x256xf32, #tpu.memory_space<vmem>>, vector<1x4x256xf32>
    %4 = vector.shape_cast %3 : vector<1x4x256xf32> to vector<4x256xf32>
    %c0_3 = arith.constant 0 : index
    %c0_4 = arith.constant 0 : index
    %c0_5 = arith.constant 0 : index
    %5 = vector.load %arg4[%c0_3, %c0_4, %c0_5] : memref<1x4x256xf32, #tpu.memory_space<vmem>>, vector<1x4x256xf32>
    %6 = vector.shape_cast %5 : vector<1x4x256xf32> to vector<4x256xf32>
    %7 = arith.mulf %4, %6 : vector<4x256xf32>
    %cst = arith.constant dense<0.000000e+00> : vector<256xf32>
    %8 = vector.multi_reduction <add>, %7, %cst [0] : vector<4x256xf32> to vector<256xf32>
    %9 = vector.shape_cast %8 : vector<256xf32> to vector<1x256xf32>
    %10 = arith.mulf %4, %4 : vector<4x256xf32>
    %cst_6 = arith.constant dense<0.000000e+00> : vector<256xf32>
    %11 = vector.multi_reduction <add>, %10, %cst_6 [0] : vector<4x256xf32> to vector<256xf32>
    %12 = vector.shape_cast %11 : vector<256xf32> to vector<1x256xf32>
    %13 = arith.mulf %6, %6 : vector<4x256xf32>
    %cst_7 = arith.constant dense<0.000000e+00> : vector<256xf32>
    %14 = vector.multi_reduction <add>, %13, %cst_7 [0] : vector<4x256xf32> to vector<256xf32>
    %15 = vector.shape_cast %14 : vector<256xf32> to vector<1x256xf32>
    %16 = vector.shape_cast %12 : vector<1x256xf32> to vector<1x1x256xf32>
    %cst_8 = arith.constant dense<0.000000e+00> : vector<1xf32>
    %17 = vector.multi_reduction <add>, %16, %cst_8 [1, 2] : vector<1x1x256xf32> to vector<1xf32>
    %18 = vector.shape_cast %17 : vector<1xf32> to vector<1x1x1xf32>
    %19 = vector.extract %18[0, 0, 0] : f32 from vector<1x1x1xf32>
    %20 = vector.shape_cast %15 : vector<1x256xf32> to vector<1x1x256xf32>
    %cst_9 = arith.constant dense<0.000000e+00> : vector<1xf32>
    %21 = vector.multi_reduction <add>, %20, %cst_9 [1, 2] : vector<1x1x256xf32> to vector<1xf32>
    %22 = vector.shape_cast %21 : vector<1xf32> to vector<1x1x1xf32>
    %23 = vector.extract %22[0, 0, 0] : f32 from vector<1x1x1xf32>
    %24 = arith.addf %19, %23 : f32
    %25 = vector.shape_cast %9 : vector<1x256xf32> to vector<1x1x256xf32>
    %cst_10 = arith.constant dense<0.000000e+00> : vector<1xf32>
    %26 = vector.multi_reduction <add>, %25, %cst_10 [1, 2] : vector<1x1x256xf32> to vector<1xf32>
    %27 = vector.shape_cast %26 : vector<1xf32> to vector<1x1x1xf32>
    %28 = vector.extract %27[0, 0, 0] : f32 from vector<1x1x1xf32>
    %cst_11 = arith.constant 2.000000e+00 : f32
    %29 = arith.mulf %cst_11, %28 : f32
    %30 = arith.subf %24, %29 : f32
    %31 = math.sqrt %12 : vector<1x256xf32>
    %32 = math.sqrt %15 : vector<1x256xf32>
    %33 = arith.mulf %31, %32 : vector<1x256xf32>
    %cst_12 = arith.constant 9.99999968E-21 : f32
    %34 = vector.broadcast %cst_12 : f32 to vector<1x256xf32>
    %35 = arith.maximumf %33, %34 : vector<1x256xf32>
    %36 = arith.divf %9, %35 : vector<1x256xf32>
    %cst_13 = arith.constant 1.000000e+00 : f32
    %37 = vector.broadcast %cst_13 : f32 to vector<1x256xf32>
    %38 = arith.subf %37, %36 : vector<1x256xf32>
    %39 = vector.shape_cast %38 : vector<1x256xf32> to vector<1x1x256xf32>
    %cst_14 = arith.constant dense<0.000000e+00> : vector<1xf32>
    %40 = vector.multi_reduction <add>, %39, %cst_14 [1, 2] : vector<1x1x256xf32> to vector<1xf32>
    %41 = vector.shape_cast %40 : vector<1xf32> to vector<1x1x1xf32>
    %42 = vector.extract %41[0, 0, 0] : f32 from vector<1x1x1xf32>
    %c0_15 = arith.constant 0 : index
    %c0_16 = arith.constant 0 : index
    %43 = vector.load %arg6[%c0_15, %c0_16] : memref<1x1xf32, #tpu.memory_space<vmem>>, vector<1x1xf32>
    %cst_17 = arith.constant 4.8828125E-4 : f32
    %44 = arith.mulf %30, %cst_17 : f32
    %c0_18 = arith.constant 0 : index
    %45 = memref.load %arg2[%c0_18] : memref<1xf32, #tpu.memory_space<smem>>
    %46 = arith.mulf %45, %42 : f32
    %cst_19 = arith.constant 0.001953125 : f32
    %47 = arith.mulf %46, %cst_19 : f32
    %48 = arith.addf %44, %47 : f32
    %49 = vector.broadcast %48 : f32 to vector<1x1xf32>
    %50 = arith.addf %43, %49 : vector<1x1xf32>
    %c0_20 = arith.constant 0 : index
    %c0_21 = arith.constant 0 : index
    %51 = vector.load %arg6[%c0_20, %c0_21] : memref<1x1xf32, #tpu.memory_space<vmem>>, vector<1x1xf32>
    tpu.vector_store %arg6[%c0_20, %c0_21], %50 {strides = array<i32>} : memref<1x1xf32, #tpu.memory_space<vmem>>, vector<1x1xf32>,
    %c0_i32_22 = arith.constant 0 : i32
    %52 = arith.cmpi eq, %arg1, %c0_i32_22 : i32
    %53 = arith.extui %52 : i1 to i32
    %c0_i32_23 = arith.constant 0 : i32
    %54 = arith.cmpi ne, %53, %c0_i32_23 : i32
    scf.if %54 {
      %c0_24 = arith.constant 0 : index
      %c0_25 = arith.constant 0 : index
      %55 = vector.load %arg6[%c0_24, %c0_25] : memref<1x1xf32, #tpu.memory_space<vmem>>, vector<1x1xf32>
      %c0_26 = arith.constant 0 : index
      %c0_27 = arith.constant 0 : index
      %c0_28 = arith.constant 0 : index
      %56 = vector.load %arg5[%c0_26, %c0_27, %c0_28] : memref<1x1x1xf32, #tpu.memory_space<vmem>>, vector<1x1x1xf32>
      %57 = vector.shape_cast %56 : vector<1x1x1xf32> to vector<1x1xf32>
      %58 = vector.shape_cast %55 : vector<1x1xf32> to vector<1x1x1xf32>
      tpu.vector_store %arg5[%c0_26, %c0_27, %c0_28], %58 {strides = array<i32>} : memref<1x1x1xf32, #tpu.memory_space<vmem>>, vector<1x1x1xf32>,
    } else {
    }
    return
  }
  func.func @transform_0(%arg0: i32, %arg1: i32, %arg2: memref<1xf32, #tpu.memory_space<smem>>) -> (i32, i32, i32) {
    %c0_i32 = arith.constant 0 : i32
    %c0_i32_0 = arith.constant 0 : i32
    return %arg0, %c0_i32, %arg1 : i32, i32, i32
  }
  func.func @transform_1(%arg0: i32, %arg1: i32, %arg2: memref<1xf32, #tpu.memory_space<smem>>) -> (i32, i32, i32) {
    %c0_i32 = arith.constant 0 : i32
    %c0_i32_0 = arith.constant 0 : i32
    return %arg0, %c0_i32, %arg1 : i32, i32, i32
  }
  func.func @transform_2(%arg0: i32, %arg1: i32, %arg2: memref<1xf32, #tpu.memory_space<smem>>) -> (i32, i32, i32) {
    %c0_i32 = arith.constant 0 : i32
    %c0_i32_0 = arith.constant 0 : i32
    %c0_i32_1 = arith.constant 0 : i32
    return %arg0, %c0_i32, %c0_i32_0 : i32, i32, i32
  }
}

</mosaic_0001>

<bundles_post_ra>
// kernel: tpu_custom_call.1
= control target key start
LH: loop header
LB: loop body
LE: loop exit
PB: predicated region body
PF: predicated region fallthrough
CT: control target
= control target key end

     0   :  { %s913_s0 = inlined_call_operand.<no memory space> [shape: f32[1], index: 0, kind: input, shape index: {}]   ;;  %s914_s1 = inlined_call_operand.hbm [shape: f32[2,4,256], index: 1, kind: input, shape index: {}]   ;;  %s915_s2 = inlined_call_operand.hbm [shape: f32[2,4,256], index: 2, kind: input, shape index: {}]   ;;  %s916_s3 = inlined_call_operand.vmem [shape: f32[2,1,1], index: 3, kind: output, shape index: {}]  }
   0x1   :  { %8 = sst [smem:[#allocation4]] %s913_s0 }
   0x2   :  { %9 = vsyncpa [#allocation6], 0 }
   0x3   :  { %11 = vsyncpa [#allocation6 + $0x1], 0 }
   0x4   :  { %12 = vsyncpa [#allocation8], 0 }
   0x5   :  { %14 = vsyncpa [#allocation8 + $0x1], 0  ;;  %s724_s14 = smov 0   ;;  %s726_s15 = smov 0  }
   0x6   :  { %s728_s16 = smov 0   ;;  %s730_s17 = smov 0  }
   0x7   :  { %s732_s18 = smov 0   ;;  %s734_s19 = smov 0  }
   0x8 LB: > { %s484_s0 = sadd.s32 4294967295, %s696_s19   ;;  %s32_s20 = sadd.s32 1, %s692_s18  ;;  %s696_s19 = sphi %s734_s19, %s20_s19   ;;  %s692_s18 = sphi %s732_s18, %s930_s18   ;;  %s688_s17 = sphi %s730_s17, %s929_s17   ;;  %s684_s16 = sphi %s728_s16, %s928_s16   ;;  %s680_s15 = sphi %s726_s15, %s927_s15   ;;  %s676_s14 = sphi %s724_s14, %s926_s14  }
   0x9   : > { %p34_p0 = scmp.ge.s32.totalorder %s32_s20, 2  ;;  %s41_s21 = sadd.s32 1, %s684_s16 }
   0xa   : > { %p48_p1 = scmp.ne.s32.totalorder %s684_s16, %s680_s15  ;;  %p49_p2 = scmp.eq.s32.totalorder %s696_s19, 0 }
   0xb   : > { %s932_s20 = smov (%p34_p0, %s32_s20), 0  ;;  %p54_p4 = scmp.ne.s32.totalorder %s680_s15, %s676_s14 }
   0xc   : > { %p760_p3 = por %p49_p2, %p48_p1  ;;  %s36_s23 = ssub.s32 %s692_s18, %s932_s20 }
   0xd   : > { %p55_p5 = scmp.eq.s32.totalorder %s484_s0, 0  ;;  %p39_p6 = scmp.eq.s32.totalorder %s36_s23, 0 }
   0xe   : > { %p520_p8 = scmp.lt.s32.totalorder %s696_s19, 2  ;;  %s776_s26 = sand.u32 1, %s684_s16  }
   0xf   : > { %p767_p7 = por %p55_p5, %p54_p4  ;;  %s499_s27 = sshll.u32 %s692_s18, 7 }
  0x10   : > { %s773_s25 = scalar_select %p39_p6, %s684_s16, %s41_s21  }
  0x11   : > { %s919_s24 = scalar_select %p767_p7, 1, 0 }
  0x12   : > { %s488_s28 = sshll.u32 %s776_s26, 3  ;;  %s785_s4 = scalar_lea.hbm %s914_s1, %s499_s27 }
  0x13   : > { %s136_s5 = scalar_lea.vmem [#allocation5], %s488_s28  ;;  %p791_p9 = pnand %p520_p8, %p760_p3 }
  0x14   : > { %s146_s6 = sshll.u32 %s136_s5, 4  ;;  %s133_s8 = scalar_lea.sflag [#allocation6], %s776_s26  ;;  %s795_s6 = int_to_ptr.vmem [resolvable:$true] %s146_s6 }
  0x15   : > { %s582_s9 = scalar_lea.hbm %s785_s4, 128  ;;  %p584_p13 = pneg %p791_p9 }
  0x16   : > { %p583_p12 = scmp.ne.s32.totalorder %s785_s4, %s582_s9  ;;  %s587_s12 = scalar_lea.hbm %s914_s1, 256 }
  0x17   : > { %p588_p2 = scmp.lt.u32.totalorder %s785_s4, %s914_s1  ;;  %p589_p3 = scmp.lt.u32.totalorder %s587_s12, %s582_s9 }
  0x18   : > { %p585_p0 = pnand %p584_p13, %p583_p12  ;;  %p591_p5 = scmp.lt.u32.totalorder %s582_s9, %s785_s4 }
  0x19   : > { %p590_p4 = por %p589_p3, %p588_p2 }
  0x1a   : > { %p586_p1 = pneg %p585_p0 }
  0x1b   : > { %p592_p6 = por %p591_p5, %p590_p4 }
  0x1d   : > { %p593_p8 = pnand %p592_p6, %p586_p1 }
  0x1f   : > { %596 = shalt.err (!%p593_p8)
}
  0x20   : > { %s597_s0 = scalar_lea.vmem %s795_s6, 128  ;;  %s698_s21 = smov [#allocation5]  }
  0x21   : > { %p598_p12 = scmp.ne.s32.totalorder %s795_s6, %s597_s0  ;;  %s602_s22 = sshll.u32 %s698_s21, 4  ;;  %s603_s22 = int_to_ptr.vmem [resolvable:$false] %s602_s22 }
  0x22   : > { %s604_s23 = scalar_lea.vmem %s603_s22, 256  ;;  %p605_p11 = scmp.lt.s32.totalorder %s795_s6, %s603_s22 }
  0x23   : > { %p600_p0 = pnand %p598_p12, %p584_p13  ;;  %p606_p2 = scmp.lt.s32.totalorder %s604_s23, %s597_s0 }
  0x25   : > { %p601_p10 = pneg %p600_p0  ;;  %p607_p3 = por %p606_p2, %p605_p11 }
  0x27   : > { %p608_p4 = pnand %p607_p3, %p601_p10 }
  0x29   : > { %611 = shalt.err (!%p608_p4)
}
  0x2a   : > { %516 = dma.hbm_to_vmem [thread:$0]  (!%p791_p9), %s785_s4, 128, %s795_s6, %s133_s8  }
  0x2b   : > { %p921_p1 = scmp.lt.s32.totalorder %s696_s19, 3  ;;  %p922_p5 = scmp.ge.s32.totalorder %s696_s19, 1 }
  0x2c   : > { %s838_s9 = scalar_lea.hbm %s915_s2, %s499_s27  ;;  %s157_s10 = scalar_lea.vmem [#allocation7], %s488_s28 }
  0x2d   : > { %p829_p6 = pnand %p922_p5, %p921_p1  ;;  %s167_s11 = sshll.u32 %s157_s10, 4  ;;  %s168_s11 = int_to_ptr.vmem [resolvable:$true] %s167_s11 }
  0x2e   : > { %s154_s4 = scalar_lea.sflag [#allocation8], %s776_s26  ;;  %s612_s6 = scalar_lea.hbm %s838_s9, 128 }
  0x2f   : > { %s923_s29 = scalar_select %p829_p6, 1, 0 }
  0x30   : > { %p613_p10 = scmp.ne.s32.totalorder %s838_s9, %s612_s6  ;;  %s617_s27 = scalar_lea.hbm %s915_s2, 256 }
  0x31   : > { %p618_p12 = scmp.lt.u32.totalorder %s838_s9, %s915_s2  ;;  %p619_p0 = scmp.lt.u32.totalorder %s617_s27, %s612_s6 }
  0x32   : > { %p615_p11 = pnand %p613_p10, %p584_p13  ;;  %p621_p3 = scmp.lt.u32.totalorder %s612_s6, %s838_s9 }
  0x33   : > { %p620_p2 = por %p619_p0, %p618_p12 }
  0x34   : > { %p616_p8 = pneg %p615_p11 }
  0x35   : > { %p622_p4 = por %p621_p3, %p620_p2 }
  0x37   : > { %p623_p1 = pnand %p622_p4, %p616_p8 }
  0x39   : > { %626 = shalt.err (!%p623_p1)
}
  0x3a   : > { %s627_s26 = scalar_lea.vmem %s168_s11, 128  ;;  %s699_s28 = smov [#allocation7]  }
  0x3b   : > { %p628_p5 = scmp.ne.s32.totalorder %s168_s11, %s627_s26  ;;  %s632_s0 = sshll.u32 %s699_s28, 4  ;;  %s633_s0 = int_to_ptr.vmem [resolvable:$false] %s632_s0 }
  0x3c   : > { %s634_s21 = scalar_lea.vmem %s633_s0, 256  ;;  %p635_p7 = scmp.lt.s32.totalorder %s168_s11, %s633_s0 }
  0x3d   : > { %p630_p10 = pnand %p628_p5, %p584_p13  ;;  %p636_p6 = scmp.lt.s32.totalorder %s634_s21, %s627_s26 }
  0x3f   : > { %p631_p11 = pneg %p630_p10  ;;  %p637_p0 = por %p636_p6, %p635_p7 }
  0x41   : > { %p638_p12 = pnand %p637_p0, %p631_p11 }
  0x43   : > { %641 = shalt.err (!%p638_p12)
}
  0x44   : > { %519 = dma.hbm_to_vmem [thread:$0]  (!%p791_p9), %s838_s9, 128, %s168_s11, %s154_s4  }
  0x45   : > { %p924_p8 = scmp.ne.s32.totalorder %s923_s29, 0 }
  0x46   : > { %s178_s22 = sand.u32 (!%p924_p8), 1, %s680_s15   ;;  %p925_p13 = scmp.ne.s32.totalorder (!%p924_p8), %s919_s24, 0 }
  0x47   : > { %176 = sbr.rel (%p924_p8) target bundleno = 360 (0x168), region = 28  ;;  %s495_s23 = sshll.u32 (!%p924_p8), %s178_s22, 3 }
  0x48   : > { %s179_s30 = scalar_lea.sflag (!%p924_p8), [#allocation6], %s178_s22  ;;  %s182_s5 = scalar_lea.vmem (!%p924_p8), [#allocation5], %s495_s23 }
  0x4e   : > { %667 = dma.done.wait (%p925_p13), %s179_s30, 128  }
  0x4f   : > { %669 = vsyncadd (%p925_p13), %s179_s30, 4294967168  ;;  %s188_s10 = scalar_lea.sflag [#allocation8], %s178_s22  ;;  %s191_s6 = scalar_lea.vmem [#allocation7], %s495_s23 }
  0x50   : > { %671 = dma.done.wait (%p925_p13), %s188_s10, 128  }
  0x51   : > { %673 = vsyncadd (%p925_p13), %s188_s10, 4294967168  ;;  %vm224_vm0 = vcmask 0   ;;  %v700_v0 = vmov 0.0   ;;  %v226_v1 = vld [vmem:[%s182_s5] sm:$0xff]  ;;  %vm232_vm1 = vcmask 1043456   ;;  %v227_v2 = vld [vmem:[%s191_s6] sm:$0xff] }
  0x52   : > { %225 = vst.msk [vmem:[#allocation2] sm:$0x1] %vm224_vm0, %v700_v0  ;;  %v247_v3 = vmul.f32 %v226_v1, %v226_v1  ;;  %v265_v4 = vmul.f32 %v227_v2, %v227_v2  ;;  %v228_v5 = vmul.f32 %v227_v2, %v226_v1  ;;  %vm283_vm2 = vcmask 1040384   ;;  %s375_s9 = sld [smem:[#allocation4]]  ;;  %p217_p7 = scmp.lt.s32.totalorder %s688_s17, 1 }
  0x54   : > { %v249_v6 = vcombine.high %v247_v3, %v247_v3  ;;  %v251_v7 = vsel %vm232_vm1, %v247_v3, 0.0  ;;  %v267_v8 = vcombine.high %v265_v4, %v265_v4  ;;  %v269_v9 = vsel %vm232_vm1, %v265_v4, 0.0  ;;  %s934_s17 = smov (!%p217_p7, %s688_s17), 1 }
  0x55   : > { %v252_v10 = vrot.slane %v251_v7, 4  ;;  %v270_v11 = vrot.slane %v269_v9, 4  ;;  %v230_v12 = vcombine.high %v228_v5, %v228_v5  ;;  %v233_v13 = vsel %vm232_vm1, %v228_v5, 0.0  ;;  %s219_s21 = scalar_lea.vmem %s916_s3, %s934_s17 }
  0x56   : > { %v258_v14 = vsel %vm232_vm1, %v249_v6, 0.0  ;;  %v276_v15 = vsel %vm232_vm1, %v267_v8, 0.0  ;;  %v234_v16 = vrot.slane %v233_v13, 4 }
  0x57   : > { %v253_v17 = vadd.f32 %v252_v10, %v251_v7  ;;  %v259_v18 = vrot.slane %v258_v14, 4  ;;  %v271_v19 = vadd.f32 %v270_v11, %v269_v9  ;;  %v277_v20 = vrot.slane %v276_v15, 4 }
  0x58   : > { %v235_v21 = vadd.f32 %v234_v16, %v233_v13  ;;  %v240_v22 = vsel %vm232_vm1, %v230_v12, 0.0 }
  0x59   : > { %v254_v23 = vrot.slane %v253_v17, 2  ;;  %v260_v24 = vadd.f32 %v259_v18, %v258_v14  ;;  %v272_v25 = vrot.slane %v271_v19, 2  ;;  %v278_v26 = vadd.f32 %v277_v20, %v276_v15 }
  0x5a   : > { %v236_v27 = vrot.slane %v235_v21, 2  ;;  %v241_v28 = vrot.slane %v240_v22, 4 }
  0x5b   : > { %v255_v29 = vadd.f32 %v254_v23, %v253_v17  ;;  %v261_v30 = vrot.slane %v260_v24, 2  ;;  %v273_v31 = vadd.f32 %v272_v25, %v271_v19  ;;  %v279_v32 = vrot.slane %v278_v26, 2 }
  0x5c   : > { %v237_v33 = vadd.f32 %v236_v27, %v235_v21  ;;  %v242_v34 = vadd.f32 %v241_v28, %v240_v22 }
  0x5d   : > { %v256_v35 = vrot.slane %v255_v29, 1  ;;  %v262_v36 = vadd.f32 %v261_v30, %v260_v24  ;;  %v274_v37 = vrot.slane %v273_v31, 1  ;;  %v280_v38 = vadd.f32 %v279_v32, %v278_v26 }
  0x5e   : > { %v238_v39 = vrot.slane %v237_v33, 1  ;;  %v243_v40 = vrot.slane %v242_v34, 2 }
  0x5f   : > { %v257_v41 = vadd.f32 %v256_v35, %v255_v29  ;;  %v263_v42 = vrot.slane %v262_v36, 1  ;;  %v281_v43 = vrot.slane %v280_v38, 1  ;;  %v275_v48 = vadd.f32 %v274_v37, %v273_v31 }
  0x60   : > { %v239_v44 = vadd.f32 %v238_v39, %v237_v33  ;;  %v244_v45 = vadd.f32 %v243_v40, %v242_v34 }
  0x61   : > { %v264_v46 = vadd.f32 %v263_v42, %v262_v36  ;;  %v284_v47 = vsel %vm283_vm2, %v257_v41, 0.0  ;;  %v282_v49 = vadd.f32 %v281_v43, %v280_v38  ;;  %570 = vrsqrt.f32 %v257_v41 }
  0x62   : > { %v245_v50 = vrot.slane %v244_v45, 1  ;;  %v296_v52 = vsel %vm283_vm2, %v275_v48, 0.0  ;;  %v309_v56 = vsel %vm283_vm2, %v239_v44, 0.0  ;;  %vm325_vm3 = vcmp.eq.f32.partialorder %v257_v41, inf }
  0x63   : > { %v285_v51 = vsel %vm283_vm2, %v264_v46, 0.0  ;;  %v297_v53 = vsel %vm283_vm2, %v282_v49, 0.0  ;;  %572 = vrsqrt.f32 %v264_v46  ;;  %v328_v62 = vand.u32 2147483648, %v257_v41 }
  0x64   : > { %v286_v54 = vadd.f32 %v285_v51, %v284_v47  ;;  %v246_v55 = vadd.f32 %v245_v50, %v244_v45  ;;  %574 = vrsqrt.f32 %v275_v48  ;;  %v298_v57 = vadd.f32 %v297_v53, %v296_v52 }
  0x65   : > { %576 = vrsqrt.f32 %v282_v49  ;;  %vm327_vm4 = vcmp.eq.f32.partialorder %v257_v41, 0.0  ;;  %vm332_vm5 = vcmp.eq.f32.partialorder %v264_v46, inf  ;;  %v335_v0 = vand.u32 2147483648, %v264_v46 }
  0x66   : > { %287 = vadd.xlane.f32.xlu0 %v286_v54  ;;  %v310_v58 = vsel %vm283_vm2, %v246_v55, 0.0  ;;  %vm339_vm6 = vcmp.eq.f32.partialorder %v275_v48, inf  ;;  %v342_v4 = vand.u32 2147483648, %v275_v48  ;;  %vm334_vm7 = vcmp.eq.f32.partialorder %v264_v46, 0.0 }
  0x67   : > { %v311_v59 = vadd.f32 %v310_v58, %v309_v56  ;;  %vm341_vm8 = vcmp.eq.f32.partialorder %v275_v48, 0.0  ;;  %vm346_vm9 = vcmp.eq.f32.partialorder %v282_v49, inf  ;;  %v349_v9 = vand.u32 2147483648, %v282_v49 }
  0x68   : > { %vm348_vm10 = vcmp.eq.f32.partialorder %v282_v49, 0.0 }
  0x69   : > { %312 = vadd.xlane.f32.xlu1 %v311_v59 }
  0x6a   : > { %299 = vadd.xlane.f32.xlu0 %v298_v57  ;;  %v373_v57 = vld [vmem:[#allocation2] sm:$0x1] }
  0x6b   : > { %v571_v60 = vpop.eup %570 }
  0x6c   : > { %v324_v61 = vmul.f32 %v571_v60, %v257_v41 }
  0x6d   : > { %v573_v63 = vpop.eup %572 }
  0x6e   : > { %v575_v1 = vpop.eup %574  ;;  %v326_v2 = vsel %vm325_vm3, %v257_v41, %v324_v61  ;;  %v331_v3 = vmul.f32 %v573_v63, %v264_v46 }
  0x6f   : > { %v338_v5 = vmul.f32 %v575_v1, %v275_v48  ;;  %v577_v6 = vpop.eup %576  ;;  %v329_v7 = vsel %vm327_vm4, %v328_v62, %v326_v2 }
  0x70   : > { %v333_v8 = vsel %vm332_vm5, %v264_v46, %v331_v3  ;;  %v345_v11 = vmul.f32 %v577_v6, %v282_v49 }
  0x71   : > { %v340_v10 = vsel %vm339_vm6, %v275_v48, %v338_v5  ;;  %v336_v12 = vsel %vm334_vm7, %v335_v0, %v333_v8 }
  0x72   : > { %v343_v13 = vsel %vm341_vm8, %v342_v4, %v340_v10  ;;  %v347_v14 = vsel %vm346_vm9, %v282_v49, %v345_v11 }
  0x73   : > { %v351_v15 = vmul.f32 %v343_v13, %v329_v7  ;;  %v350_v16 = vsel %vm348_vm10, %v349_v9, %v347_v14 }
  0x74   : > { %v352_v17 = vmul.f32 %v350_v16, %v336_v12 }
  0x75   : > { %v353_v18 = vmax.f32 %v351_v15, 1e-20 }
  0x76   : > { %v354_v19 = vmax.f32 %v352_v17, 1e-20 }
  0x77   : > { %578 = vrcp.f32 %v353_v18 }
  0x78   : > { %580 = vrcp.f32 %v354_v19 }
  0x81   : > { %v579_v20 = vpop.eup %578 }
  0x82   : > { %v356_v21 = vmul.f32 %v579_v20, %v239_v44  ;;  %v581_v22 = vpop.eup %580 }
  0x83   : > { %v358_v23 = vmul.f32 %v581_v22, %v246_v55 }
  0x84   : > { %v359_v24 = vsub.f32 1.0, %v356_v21 }
  0x85   : > { %v360_v25 = vsub.f32 1.0, %v358_v23 }
  0x86   : > { %v361_v26 = vsel %vm283_vm2, %v359_v24, 0.0 }
  0x87   : > { %v362_v27 = vsel %vm283_vm2, %v360_v25, 0.0 }
  0x88   : > { %v363_v28 = vadd.f32 %v362_v27, %v361_v26 }
  0x8a   : > { %364 = vadd.xlane.f32.xlu1 %v363_v28 }
  0xf3   : > { %v288_v29 = vpop.xlane.xlu0 %287 }
  0xf4   : > { %v289_v30 = vrot.slane %v288_v29, 4 }
  0xf6   : > { %v290_v31 = vadd.f32 %v289_v30, %v288_v29  ;;  %v313_v32 = vpop.xlane.xlu1 %312 }
  0xf7   : > { %v300_v33 = vpop.xlane.xlu0 %299  ;;  %v314_v34 = vrot.slane %v313_v32, 4 }
  0xf8   : > { %v291_v35 = vrot.slane %v290_v31, 2  ;;  %v301_v36 = vrot.slane %v300_v33, 4 }
  0xf9   : > { %v315_v37 = vadd.f32 %v314_v34, %v313_v32 }
  0xfa   : > { %v302_v38 = vadd.f32 %v301_v36, %v300_v33  ;;  %v292_v39 = vadd.f32 %v291_v35, %v290_v31 }
  0xfb   : > { %v316_v40 = vrot.slane %v315_v37, 2 }
  0xfc   : > { %v303_v41 = vrot.slane %v302_v38, 2  ;;  %v293_v42 = vrot.slane %v292_v39, 1 }
  0xfd   : > { %v317_v43 = vadd.f32 %v316_v40, %v315_v37 }
  0xfe   : > { %v304_v44 = vadd.f32 %v303_v41, %v302_v38  ;;  %v294_v45 = vadd.f32 %v293_v42, %v292_v39 }
  0xff   : > { %v318_v46 = vrot.slane %v317_v43, 1 }
 0x100   : > { %501 = vpush %v294_v45  ;;  %v305_v47 = vrot.slane %v304_v44, 1 }
 0x101   : > { %v319_v48 = vadd.f32 %v318_v46, %v317_v43 }
 0x102   : > { %v306_v49 = vadd.f32 %v305_v47, %v304_v44 }
 0x104   : > { %503 = vpush %v306_v49 }
 0x105   : > { %505 = vpush %v319_v48 }
 0x117   : > { %v365_v50 = vpop.xlane.xlu1 %364 }
 0x118   : > { %v366_v51 = vrot.slane %v365_v50, 4 }
 0x11a   : > { %v367_v52 = vadd.f32 %v366_v51, %v365_v50 }
 0x11c   : > { %v368_v53 = vrot.slane %v367_v52, 2 }
 0x11e   : > { %v369_v54 = vadd.f32 %v368_v53, %v367_v52 }
 0x120   : > { %v370_v55 = vrot.slane %v369_v54, 1 }
 0x122   : > { %v371_v56 = vadd.f32 %v370_v55, %v369_v54 }
 0x124   : > { %507 = vpush %v371_v56 }
 0x131   : > { %s502_s24 = spop %501 }
 0x135   : > { %s504_s7 = spop %503 }
 0x136   : > { %s506_s29 = spop %505  ;;  %s308_s11 = sadd.f32 %s504_s7, %s502_s24 }
 0x137   : > { %s321_s4 = smul.f32 2.0, %s506_s29 }
 0x139   : > { %s322_s8 = ssub.f32 %s308_s11, %s321_s4 }
 0x13b   : > { %s374_s13 = smul.f32 0.00048828125, %s322_s8 }
 0x155   : > { %s508_s12 = spop %507 }
 0x156   : > { %s376_s27 = smul.f32 %s508_s12, %s375_s9 }
 0x158   : > { %s377_s14 = smul.f32 0.001953125, %s376_s27 }
 0x15a   : > { %s378_s26 = sadd.f32 %s377_s14, %s374_s13 }
 0x15c   : > { %v379_v58 = vstv %s378_s26 }
 0x15d   : > { %v380_v59 = vadd.f32 %v379_v58, %v373_v57 }
 0x15f   : > { %382 = vst.msk [vmem:[#allocation2] sm:$0x1] %vm224_vm0, %v380_v59 }
 0x166   : > { %v386_v60 = vld [vmem:[#allocation2] sm:$0x1] }
 0x167   : > { %387 = vst.msk [vmem:[%s219_s21] sm:$0x1] %vm224_vm0, %v386_v60 }
 0x168 PF: > { %s20_s19 = sadd.s32 1, %s696_s19   ;;  %s926_s14 = smov %s680_s15 }
 0x169   : > { %p17_p9 = scmp.ge.s32.totalorder %s20_s19, 4   ;;  %s927_s15 = smov %s684_s16 }
 0x16a   : > { %s928_s16 = smov %s773_s25  ;;  %s929_s17 = smov %s692_s18 }
 0x16b   : > { %s930_s18 = smov %s932_s20  ;;  %19 = sbr.rel (!%p17_p9) target bundleno = 8 (0x8), region = 89 }
 0x172   :  { %405 = vsyncpa [#allocation6], 1 }
 0x173   :  { %407 = vsyncpa [#allocation6 + $0x1], 1 }
 0x174   :  { %408 = vsyncpa [#allocation8], 1 }
 0x175   :  { %410 = vsyncpa [#allocation8 + $0x1], 1 }

</bundles_post_ra>
